<compile_context>
chip_gen: v5e
topology: v5e:2x2
jax: 0.10.0
libtpu: 0.0.40
codegen_flags: <defaults>
</compile_context>

<pallas_src>
import jax
import jax.numpy as jnp
import numpy as np
from jax import lax
from jax.experimental import pallas as pl
from jax.experimental.pallas import tpu as pltpu


def _round_up(x, m):
    return ((x + m - 1) // m) * m


def _cdiv(a, b):
    return -(-a // b)


def _vmem_limit_bytes():
    """Per-generation scoped-VMEM budget (~half of physical, capped)."""
    cap = 64 * 1024 * 1024  # conservative fallback (v7x-sized per-TC VMEM)
    try:
        info = pltpu.get_tpu_info()
        cap = int(getattr(info, "vmem_capacity_bytes", cap))
    except Exception:
        pass
    return max(16 * 1024 * 1024, min(cap // 2, 96 * 1024 * 1024))


def _choose_tiles(m, k, n_pad, out_bytes, budget, tile_m):
    """Pick (tm, tn) so double-buffered patch/weight/output tiles fit VMEM."""
    def use(tm, tn):
        return (2 * tm * k * 2          # patch tile, bf16, double-buffered
                + 2 * k * tn * 2        # fused weight tile, bf16, double-buffered
                + 2 * tm * tn * out_bytes  # output tile, double-buffered
                + n_pad * 4)            # bias
    tm0 = min(tile_m, _round_up(m, 8))
    for tm in (tm0, 512, 256, 128, 64, 32, 16, 8):
        if tm > tm0:
            continue
        for tn in (n_pad, 512, 384, 256, 128):
            if tn > n_pad or n_pad % tn != 0:
                continue
            if use(tm, tn) <= budget:
                return tm, tn
    return 8, 128


def _fused_conv_gemm_kernel(p_ref, w_ref, b_ref, o_ref):
    # p_ref: (tm, K)  bf16 im2col patch tile
    # w_ref: (K,  tn) bf16 fused weight tile (VMEM-resident when N grid == 1)
    # b_ref: (1,  tn) f32  bias tile
    # o_ref: (tm, tn)      output tile
    acc = jnp.dot(p_ref[...], w_ref[...], preferred_element_type=jnp.float32)
    o_ref[...] = (acc + b_ref[...]).astype(o_ref.dtype)


def _im2col_nhwc(x_nhwc, kh, kw, stride, padding, dilation):
    """NHWC im2col: [N,H,W,C] -> [N*OH*OW, kh*kw*C], features in (i, j, c) order."""
    n, h, w, c = x_nhwc.shape
    xp = jnp.pad(x_nhwc, ((0, 0), (padding, padding), (padding, padding), (0, 0)))
    hp = h + 2 * padding
    wp = w + 2 * padding
    oh = (hp - dilation * (kh - 1) - 1) // stride + 1
    ow = (wp - dilation * (kw - 1) - 1) // stride + 1
    cols = []
    for i in range(kh):
        for j in range(kw):
            r0 = i * dilation
            c0 = j * dilation
            cols.append(
                xp[:, r0:r0 + stride * oh:stride, c0:c0 + stride * ow:stride, :])
    # [N, OH, OW, kh*kw, C] -> [M, K]   (no extra pad copy of this big array)
    p = jnp.stack(cols, axis=3).reshape(n * oh * ow, kh * kw * c)
    return p, oh, ow


def lora_injected_conv2d(x, conv_w, conv_b, lora_down_w, lora_up_w, *,
                         stride=1, padding=0, dilation=1, scale=1.0,
                         tile_m=512, out_dtype=jnp.float32):
    """Pallas-backed forward of LoraInjectedConv2d (groups=1, eval mode).

    x:           [N, Cin, H, W]        float32, NCHW (PyTorch convention)
    conv_w:      [Cout, Cin, KH, KW]
    conv_b:      [Cout]
    lora_down_w: [r, Cin, KH, KW]
    lora_up_w:   [Cout, r, 1, 1]
    returns:     [N, Cout, OH, OW]     out_dtype, NCHW
    """
    n, cin, _, _ = x.shape
    cout, wcin, kh, kw = conv_w.shape
    assert wcin == cin, "groups != 1 is not supported by this kernel"
    r = lora_down_w.shape[0]
    k = cin * kh * kw

    # ---- LoRA weight fusion in f32 (exact in eval mode).
    # K ordering is (i, j, c), matching the NHWC im2col below.
    w2d = jnp.transpose(conv_w, (0, 2, 3, 1)).reshape(cout, k).astype(jnp.float32)
    a2d = jnp.transpose(lora_down_w, (0, 2, 3, 1)).reshape(r, k).astype(jnp.float32)
    b2d = lora_up_w.reshape(cout, r).astype(jnp.float32)
    w_eff = w2d + jnp.float32(scale) * (b2d @ a2d)                    # [Cout, K]

    # ---- NHWC im2col, bf16 operands. No M/K padding of the patch matrix.
    x_nhwc = jnp.transpose(x, (0, 2, 3, 1)).astype(jnp.bfloat16)
    patches, oh, ow = _im2col_nhwc(x_nhwc, kh, kw, stride, padding, dilation)
    m = patches.shape[0]

    # ---- lane-pad only the (tiny) weight / bias on the Cout axis.
    n_pad = _round_up(cout, 128)
    w_eff_t = jnp.pad(w_eff.T, ((0, 0), (0, n_pad - cout))).astype(jnp.bfloat16)
    bias = jnp.pad(conv_b.astype(jnp.float32).reshape(1, cout),
                   ((0, 0), (0, n_pad - cout)))                        # [1, Np]

    out_bytes = jnp.dtype(out_dtype).itemsize
    limit = _vmem_limit_bytes()
    tm, tn = _choose_tiles(m, k, n_pad, out_bytes, int(limit * 0.9), tile_m)
    # v7x megacore: keep >= 2 parallel grid steps when there is enough work.
    if _cdiv(m, tm) * (n_pad // tn) < 2 and m > 8:
        tm2 = max(8, _round_up(_cdiv(m, 2), 8))
        if _cdiv(m, tm2) >= 2:
            tm = tm2

    grid = (_cdiv(m, tm), n_pad // tn)   # N innermost: patches stream once
    out = pl.pallas_call(
        _fused_conv_gemm_kernel,
        out_shape=jax.ShapeDtypeStruct((m, n_pad), out_dtype),
        grid=grid,
        in_specs=[
            pl.BlockSpec((tm, k), lambda i, j: (i, 0)),   # patches (full-K block)
            pl.BlockSpec((k, tn), lambda i, j: (0, j)),   # fused weight (resident if Nj==1)
            pl.BlockSpec((1, tn), lambda i, j: (0, j)),   # bias
        ],
        out_specs=pl.BlockSpec((tm, tn), lambda i, j: (i, j)),
        compiler_params=pltpu.CompilerParams(
            dimension_semantics=("parallel", "parallel"),
            vmem_limit_bytes=limit),
    )(patches, w_eff_t, bias)

    out = out[:, :cout]                                   # drop lane padding
    # [M, Cout] -> [N, OH, OW, Cout] -> NCHW (kept for PyTorch parity;
    # NHWC consumers can skip this transpose).
    out = out.reshape(n, oh, ow, cout).transpose(0, 3, 1, 2)
    return out


def _reference(x, conv_w, conv_b, lora_down_w, lora_up_w, *,
               stride, padding, dilation, scale):
    dn = lax.conv_dimension_numbers(x.shape, conv_w.shape,
                                    ("NCHW", "OIHW", "NCHW"))
    conv = lax.conv_general_dilated(
        x, conv_w, (stride, stride), [(padding, padding)] * 2,
        rhs_dilation=(dilation, dilation), dimension_numbers=dn)
    conv = conv + conv_b[None, :, None, None]
    down = lax.conv_general_dilated(
        x, lora_down_w, (stride, stride), [(padding, padding)] * 2,
        rhs_dilation=(dilation, dilation), dimension_numbers=dn)
    dn1 = lax.conv_dimension_numbers(down.shape, lora_up_w.shape,
                                     ("NCHW", "OIHW", "NCHW"))
    up = lax.conv_general_dilated(down, lora_up_w, (1, 1), [(0, 0)] * 2,
                                  dimension_numbers=dn1)
    return conv + up * scale


if __name__ == "__main__":
    # Module hyperparameters (groups=1, bias=True, eval mode).
    in_channels, out_channels = 4, 8
    kernel_size, stride, padding, dilation = 3, 1, 1, 1
    r, scale = 4, 1.0

    key = jax.random.PRNGKey(0)
    k_x, k_w, k_b, k_down, k_up = jax.random.split(key, 5)

    x = jax.random.normal(k_x, (2, in_channels, 16, 16), dtype=jnp.float32)
    conv_w = jax.random.normal(
        k_w, (out_channels, in_channels, kernel_size, kernel_size),
        dtype=jnp.float32) * 0.1
    conv_b = jax.random.normal(k_b, (out_channels,), dtype=jnp.float32) * 0.1
    # nn.init.normal_(lora_down.weight, std=1/r)
    lora_down_w = jax.random.normal(
        k_down, (r, in_channels, kernel_size, kernel_size),
        dtype=jnp.float32) * (1.0 / r)
    # nn.init.zeros_(lora_up.weight)  -- module's actual init
    lora_up_w = jnp.zeros((out_channels, r, 1, 1), dtype=jnp.float32)

    out = lora_injected_conv2d(
        x, conv_w, conv_b, lora_down_w, lora_up_w,
        stride=stride, padding=padding, dilation=dilation, scale=scale)
    out = jax.block_until_ready(out)
    ref = _reference(x, conv_w, conv_b, lora_down_w, lora_up_w,
                     stride=stride, padding=padding, dilation=dilation,
                     scale=scale)
    np.testing.assert_allclose(np.asarray(out), np.asarray(ref),
                               rtol=2e-2, atol=2e-2)

    # Second check with a non-zero lora_up to exercise the fused LoRA path.
    lora_up_w2 = jax.random.normal(
        k_up, (out_channels, r, 1, 1), dtype=jnp.float32) * 0.1
    out2 = lora_injected_conv2d(
        x, conv_w, conv_b, lora_down_w, lora_up_w2,
        stride=stride, padding=padding, dilation=dilation, scale=scale)
    out2 = jax.block_until_ready(out2)
    ref2 = _reference(x, conv_w, conv_b, lora_down_w, lora_up_w2,
                      stride=stride, padding=padding, dilation=dilation,
                      scale=scale)
    np.testing.assert_allclose(np.asarray(out2), np.asarray(ref2),
                               rtol=2e-2, atol=2e-2)

    print("KERNEL_OK")
</pallas_src>

<mosaic_0001>
module attributes {stable_mosaic.version = 11 : i64} {
  func.func @_fused_conv_gemm_kernel(%arg0: i32, %arg1: i32, %arg2: memref<256x36xbf16, #tpu.memory_space<vmem>>, %arg3: memref<36x128xbf16, #tpu.memory_space<vmem>>, %arg4: memref<1x128xf32, #tpu.memory_space<vmem>>, %arg5: memref<256x128xf32, #tpu.memory_space<vmem>>) attributes {dimension_semantics = [#tpu.dimension_semantics<parallel>, #tpu.dimension_semantics<parallel>], iteration_bounds = array<i64: 2, 1>, scalar_prefetch = 0 : i64, scratch_operands = 0 : i64, tpu.core_type = #tpu.core_type<tc>, window_params = [{transform_indices = @transform_0, window_bounds = array<i64: 256, 36>}, {transform_indices = @transform_1, window_bounds = array<i64: 36, 128>}, {transform_indices = @transform_2, window_bounds = array<i64: 1, 128>}, {transform_indices = @transform_3, window_bounds = array<i64: 256, 128>}]} {
    %c0 = arith.constant 0 : index
    %c0_0 = arith.constant 0 : index
    %0 = vector.load %arg2[%c0, %c0_0] : memref<256x36xbf16, #tpu.memory_space<vmem>>, vector<256x36xbf16>
    %c0_1 = arith.constant 0 : index
    %c0_2 = arith.constant 0 : index
    %1 = vector.load %arg3[%c0_1, %c0_2] : memref<36x128xbf16, #tpu.memory_space<vmem>>, vector<36x128xbf16>
    %cst = arith.constant dense<0.000000e+00> : vector<256x128xf32>
    %2 = tpu.matmul %0, %1, %cst {dimension_numbers = #tpu.dot_dimension_numbers<[1], [0], [0], [1], [0, 0, 1, 1], [], []>} : vector<256x36xbf16>, vector<36x128xbf16>, vector<256x128xf32> -> vector<256x128xf32>
    %c0_3 = arith.constant 0 : index
    %c0_4 = arith.constant 0 : index
    %3 = vector.load %arg4[%c0_3, %c0_4] : memref<1x128xf32, #tpu.memory_space<vmem>>, vector<1x128xf32>
    %4 = vector.broadcast %3 : vector<1x128xf32> to vector<256x128xf32>
    %5 = arith.addf %2, %4 : vector<256x128xf32>
    %c0_5 = arith.constant 0 : index
    %c0_6 = arith.constant 0 : index
    %6 = vector.load %arg5[%c0_5, %c0_6] : memref<256x128xf32, #tpu.memory_space<vmem>>, vector<256x128xf32>
    tpu.vector_store %arg5[%c0_5, %c0_6], %5 {strides = array<i32>} : memref<256x128xf32, #tpu.memory_space<vmem>>, vector<256x128xf32>,
    return
  }
  func.func @transform_0(%arg0: i32, %arg1: i32) -> (i32, i32) {
    %c0_i32 = arith.constant 0 : i32
    %c0_i32_0 = arith.constant 0 : i32
    return %arg0, %c0_i32 : i32, i32
  }
  func.func @transform_1(%arg0: i32, %arg1: i32) -> (i32, i32) {
    %c0_i32 = arith.constant 0 : i32
    %c0_i32_0 = arith.constant 0 : i32
    return %c0_i32, %arg1 : i32, i32
  }
  func.func @transform_2(%arg0: i32, %arg1: i32) -> (i32, i32) {
    %c0_i32 = arith.constant 0 : i32
    %c0_i32_0 = arith.constant 0 : i32
    return %c0_i32, %arg1 : i32, i32
  }
  func.func @transform_3(%arg0: i32, %arg1: i32) -> (i32, i32) {
    %c0_i32 = arith.constant 0 : i32
    return %arg0, %arg1 : i32, i32
  }
}

</mosaic_0001>

<bundles_post_ra>
// kernel: tpu_custom_call.1
= control target key start
LH: loop header
LB: loop body
LE: loop exit
PB: predicated region body
PF: predicated region fallthrough
CT: control target
= control target key end

     0   :  { %8 = vsyncpa [#allocation3], 0  ;;  %s1150_s0 = inlined_call_operand.vmem [shape: bf16[512,36], index: 0, kind: input, shape index: {}]   ;;  %s1151_s1 = inlined_call_operand.vmem [shape: bf16[36,128], index: 1, kind: input, shape index: {}]   ;;  %s1152_s2 = inlined_call_operand.vmem [shape: f32[1,128], index: 2, kind: input, shape index: {}]   ;;  %s1153_s3 = inlined_call_operand.hbm [shape: f32[512,128], index: 3, kind: output, shape index: {}]  }
   0x1   :  { %10 = vsyncpa [#allocation3 + $0x1], 0  ;;  %s935_s12 = smov 0   ;;  %s937_s13 = smov 0  }
   0x2   :  { %s939_s14 = smov 0   ;;  %s941_s15 = smov 0  }
   0x3   :  { %s943_s16 = smov 0   ;;  %s945_s17 = smov 0  }
   0x4 LB: > { %s644_s18 = sadd.s32 4294967295, %s911_s17   ;;  %s645_s19 = sadd.s32 4294967294, %s911_s17   ;;  %s911_s17 = sphi %s945_s17, %s16_s17   ;;  %s907_s16 = sphi %s943_s16, %s1160_s16   ;;  %s903_s15 = sphi %s941_s15, %s1159_s15   ;;  %s899_s14 = sphi %s939_s14, %s1158_s14   ;;  %s895_s13 = sphi %s937_s13, %s1157_s13   ;;  %s891_s12 = sphi %s935_s12, %s1156_s12  }
   0x5   : > { %s28_s20 = sadd.s32 1, %s907_s16  ;;  %s115_s21 = sadd.s32 1, %s899_s14 }
   0x6   : > { %p30_p0 = scmp.ge.s32.totalorder %s28_s20, 2  ;;  %p125_p1 = scmp.ne.s32.totalorder %s899_s14, %s895_s13 }
   0x7   : > { %p126_p2 = scmp.eq.s32.totalorder %s644_s18, 1  ;;  %p131_p3 = scmp.ne.s32.totalorder %s895_s13, %s891_s12 }
   0x8   : > { %s1162_s20 = smov (%p30_p0, %s28_s20), 0  ;;  %p132_p5 = scmp.eq.s32.totalorder %s645_s19, 1 }
   0x9   : > { %p975_p4 = por %p126_p2, %p125_p1  ;;  %s110_s23 = ssub.s32 %s907_s16, %s1162_s20 }
   0xa   : > { %p650_p6 = scmp.ge.s32.totalorder %s911_s17, 1  ;;  %p113_p7 = scmp.eq.s32.totalorder %s110_s23, 0 }
   0xb   : > { %p982_p8 = por %p132_p5, %p131_p3  ;;  %p172_p9 = scmp.lt.s32.totalorder %s911_s17, 3 }
   0xc   : > { %s988_s25 = scalar_select %p113_p7, %s899_s14, %s115_s21  }
   0xd   : > { %p173_p10 = pnand %p650_p6, %p172_p9 }
   0xe   : > { %s652_s28 = sshll.u32 (!%p173_p10), %s903_s15, 5  ;;  %s200_s10 = sand.u32 (!%p173_p10), 1, %s895_s13  }
   0xf   : > { %176 = sbr.rel (%p173_p10) target bundleno = 233 (0xe9), region = 32  ;;  %p204_p11 = scmp.lt.s32.totalorder (!%p173_p10), %s652_s28, 63 }
  0x10   : > { %s651_s11 = sshll.u32 (!%p173_p10), %s200_s10, 8  ;;  %s765_s23 = sshll.u32 (!%p173_p10), %s903_s15, 8 }
  0x11   : > { %s1047_s21 = scalar_lea.vmem (!%p173_p10), [#allocation2], %s651_s11  ;;  %s529_s30 = scalar_lea.sflag (!%p173_p10), [#allocation3], %s200_s10 }
  0x12   : > { %s542_s15 = sshll.u32 (!%p173_p10), %s1047_s21, 4  ;;  %s853_s8 = scalar_lea.hbm (!%p173_p10), %s1153_s3, 512  ;;  %s543_s15 = int_to_ptr.vmem [resolvable:$true] %s542_s15 }
  0x14   : > { %v254_v0 = vld [vmem:[%s1151_s1 + $0x10] sm:$0x3]  ;;  %vm403_vm0 = vcmask 1041408   ;;  %s1164_s28 = smov (!%p204_p11, %s652_s28), 63  ;;  %v764_v4 = vld [vmem:[%s1151_s1 + $0x8] sm:$0xff]  ;;  %v763_v5 = vld [vmem:[%s1151_s1] sm:$0xff] }
  0x15   : > { %v348_v1 = vunpack.c.l.b16 %v254_v0  ;;  %s653_s4 = sshll.u32 %s1164_s28, 2  ;;  %vm354_vm1 = vcmask 293888   ;;  %v1043_v22 = vld [vmem:[%s1152_s2] ss:$0 sm:$0xff]  ;;  %s541_s28 = scalar_lea.hbm %s1153_s3, %s765_s23 }
  0x16   : > { %s1003_s9 = scalar_lea.vmem %s1150_s0, %s653_s4  ;;  %s544_s29 = sshll.u32 %s541_s28, 4  ;;  %s545_s29 = int_to_ptr.hbm [resolvable:$true] %s544_s29 }
  0x17   : > { %v351_v2 = vpack.c.b16 %v348_v1, %v348_v1  ;;  %v747_v6 = vld [vmem:[%s1003_s9] sm:$0xff]  ;;  %v748_v10 = vld [vmem:[%s1003_s9 + $0x8] sm:$0xff]  ;;  %v749_v14 = vld [vmem:[%s1003_s9 + $0x10] sm:$0xff]  ;;  %s847_s4 = sshra.s32 %s545_s29, 4  ;;  %s848_s4 = int_to_ptr.hbm [resolvable:$true] %s847_s4 }
  0x18   : > { %v751_v7 = vld [vmem:[%s1003_s9 + $0x20] sm:$0xff]  ;;  %v752_v11 = vld [vmem:[%s1003_s9 + $0x28] sm:$0xff]  ;;  %v753_v15 = vld [vmem:[%s1003_s9 + $0x30] sm:$0xff]  ;;  %s849_s5 = scalar_lea.hbm %s848_s4, 256  ;;  %p854_p1 = scmp.lt.s32.totalorder %s848_s4, %s1153_s3 }
  0x19   : > { %v405_v3 = vsel %vm403_vm0, %v351_v2, 0  ;;  %v755_v8 = vld [vmem:[%s1003_s9 + $0x40] sm:$0xff]  ;;  %v756_v12 = vld [vmem:[%s1003_s9 + $0x48] sm:$0xff]  ;;  %v757_v16 = vld [vmem:[%s1003_s9 + $0x50] sm:$0xff]  ;;  %p850_p12 = scmp.ne.s32.totalorder %s848_s4, %s849_s5  ;;  %p855_p2 = scmp.lt.s32.totalorder %s853_s8, %s849_s5 }
  0x1a   : > { %412 = vmatpush.bf16.msra.mxu0 %v405_v3  ;;  %766 = vmatpush.bf16.msra.mxu1 %v405_v3  ;;  %v759_v9 = vld [vmem:[%s1003_s9 + $0x60] sm:$0xff]  ;;  %v760_v13 = vld [vmem:[%s1003_s9 + $0x68] sm:$0xff]  ;;  %v761_v17 = vld [vmem:[%s1003_s9 + $0x70] sm:$0xff] }
  0x1b   : > { %767 = vmatpush.bf16.msra.mxu2 %v405_v3  ;;  %768 = vmatpush.bf16.msra.mxu3 %v405_v3  ;;  %v750_v18 = vld [vmem:[%s1003_s9 + $0x18] sm:$0xff]  ;;  %p851_p13 = pnand %p850_p12, %p975_p4  ;;  %p856_p3 = por %p855_p2, %p854_p1 }
  0x1c   : > { %v754_v19 = vld [vmem:[%s1003_s9 + $0x38] sm:$0xff] }
  0x1d   : > { %v758_v20 = vld [vmem:[%s1003_s9 + $0x58] sm:$0xff]  ;;  %p852_p0 = pneg %p851_p13 }
  0x1e   : > { %413 = vmatpush.bf16.msra.mxu0 %v764_v4  ;;  %769 = vmatpush.bf16.msra.mxu1 %v764_v4  ;;  %v762_v21 = vld [vmem:[%s1003_s9 + $0x78] sm:$0xff] }
  0x1f   : > { %770 = vmatpush.bf16.msra.mxu2 %v764_v4  ;;  %771 = vmatpush.bf16.msra.mxu3 %v764_v4  ;;  %p857_p5 = pnand %p856_p3, %p852_p0 }
  0x22   : > { %414 = vmatpush.bf16.msra.mxu0 %v763_v5  ;;  %772 = vmatpush.bf16.msra.mxu1 %v763_v5 }
  0x23   : > { %773 = vmatpush.bf16.msra.mxu2 %v763_v5  ;;  %774 = vmatpush.bf16.msra.mxu3 %v763_v5 }
  0x25   : > { %726 = vmatmul.msk.bf16.vlgmr.msra.gmra.mxu0 %vm354_vm1, %v747_v6  ;;  %730 = vmatmul.msk.bf16.vlgmr.msra.gmra.mxu1 %vm354_vm1, %v751_v7 }
  0x26   : > { %734 = vmatmul.msk.bf16.vlgmr.msra.gmra.mxu2 %vm354_vm1, %v755_v8  ;;  %738 = vmatmul.msk.bf16.vlgmr.msra.gmra.mxu3 %vm354_vm1, %v759_v9 }
  0x35   : > { %727 = vmatmul.msk.bf16.gmra.mxu0 %vm354_vm1, %v748_v10  ;;  %731 = vmatmul.msk.bf16.gmra.mxu1 %vm354_vm1, %v752_v11 }
  0x36   : > { %735 = vmatmul.msk.bf16.gmra.mxu2 %vm354_vm1, %v756_v12  ;;  %739 = vmatmul.msk.bf16.gmra.mxu3 %vm354_vm1, %v760_v13 }
  0x45   : > { %728 = vmatmul.msk.bf16.gmra.mxu0 %vm354_vm1, %v749_v14  ;;  %732 = vmatmul.msk.bf16.gmra.mxu1 %vm354_vm1, %v753_v15 }
  0x46   : > { %736 = vmatmul.msk.bf16.gmra.mxu2 %vm354_vm1, %v757_v16  ;;  %740 = vmatmul.msk.bf16.gmra.mxu3 %vm354_vm1, %v761_v17 }
  0x55   : > { %729 = vmatmul.msk.bf16.gmra.mxu0 %vm354_vm1, %v750_v18  ;;  %733 = vmatmul.msk.bf16.gmra.mxu1 %vm354_vm1, %v754_v19 }
  0x56   : > { %737 = vmatmul.msk.bf16.gmra.mxu2 %vm354_vm1, %v758_v20  ;;  %741 = vmatmul.msk.bf16.gmra.mxu3 %vm354_vm1, %v762_v21 }
  0xa2   : > { %v416_v23 = vpop.f32.mrf.mxu0  ;;  %v436_v24 = vpop.f32.mrf.mxu1 }
  0xa3   : > { %v417_v25 = vadd.f32 %v1043_v22, %v416_v23  ;;  %v437_v26 = vadd.f32 %v1043_v22, %v436_v24 }
  0xa5   : > { %496 = vst [vmem:[%s1047_s21] sm:$0xff] %v417_v25 }
  0xa6   : > { %504 = vst [vmem:[%s1047_s21 + $0x40] sm:$0xff] %v437_v26 }
  0xa9   : > { %v456_v27 = vpop.f32.mrf.mxu2  ;;  %v476_v28 = vpop.f32.mrf.mxu3 }
  0xaa   : > { %v457_v29 = vadd.f32 %v1043_v22, %v456_v27  ;;  %v477_v30 = vadd.f32 %v1043_v22, %v476_v28  ;;  %v418_v31 = vpop.f32.mrf.mxu0  ;;  %v438_v32 = vpop.f32.mrf.mxu1 }
  0xab   : > { %v419_v33 = vadd.f32 %v1043_v22, %v418_v31  ;;  %v439_v34 = vadd.f32 %v1043_v22, %v438_v32 }
  0xac   : > { %512 = vst [vmem:[%s1047_s21 + $0x80] sm:$0xff] %v457_v29 }
  0xad   : > { %520 = vst [vmem:[%s1047_s21 + $0xc0] sm:$0xff] %v477_v30 }
  0xae   : > { %497 = vst [vmem:[%s1047_s21 + $0x8] sm:$0xff] %v419_v33 }
  0xaf   : > { %505 = vst [vmem:[%s1047_s21 + $0x48] sm:$0xff] %v439_v34 }
  0xb1   : > { %v458_v35 = vpop.f32.mrf.mxu2  ;;  %v478_v36 = vpop.f32.mrf.mxu3 }
  0xb2   : > { %v459_v37 = vadd.f32 %v1043_v22, %v458_v35  ;;  %v479_v38 = vadd.f32 %v1043_v22, %v478_v36  ;;  %v421_v39 = vpop.f32.mrf.mxu0  ;;  %v441_v40 = vpop.f32.mrf.mxu1 }
  0xb3   : > { %v422_v41 = vadd.f32 %v1043_v22, %v421_v39  ;;  %v442_v42 = vadd.f32 %v1043_v22, %v441_v40 }
  0xb4   : > { %513 = vst [vmem:[%s1047_s21 + $0x88] sm:$0xff] %v459_v37 }
  0xb5   : > { %521 = vst [vmem:[%s1047_s21 + $0xc8] sm:$0xff] %v479_v38 }
  0xb6   : > { %498 = vst [vmem:[%s1047_s21 + $0x10] sm:$0xff] %v422_v41 }
  0xb7   : > { %506 = vst [vmem:[%s1047_s21 + $0x50] sm:$0xff] %v442_v42 }
  0xb9   : > { %v461_v43 = vpop.f32.mrf.mxu2  ;;  %v481_v44 = vpop.f32.mrf.mxu3 }
  0xba   : > { %v462_v45 = vadd.f32 %v1043_v22, %v461_v43  ;;  %v482_v46 = vadd.f32 %v1043_v22, %v481_v44  ;;  %v423_v47 = vpop.f32.mrf.mxu0  ;;  %v443_v48 = vpop.f32.mrf.mxu1 }
  0xbb   : > { %v424_v49 = vadd.f32 %v1043_v22, %v423_v47  ;;  %v444_v50 = vadd.f32 %v1043_v22, %v443_v48 }
  0xbc   : > { %514 = vst [vmem:[%s1047_s21 + $0x90] sm:$0xff] %v462_v45 }
  0xbd   : > { %522 = vst [vmem:[%s1047_s21 + $0xd0] sm:$0xff] %v482_v46 }
  0xbe   : > { %499 = vst [vmem:[%s1047_s21 + $0x18] sm:$0xff] %v424_v49 }
  0xbf   : > { %507 = vst [vmem:[%s1047_s21 + $0x58] sm:$0xff] %v444_v50 }
  0xc1   : > { %v463_v51 = vpop.f32.mrf.mxu2  ;;  %v483_v52 = vpop.f32.mrf.mxu3 }
  0xc2   : > { %v464_v53 = vadd.f32 %v1043_v22, %v463_v51  ;;  %v484_v54 = vadd.f32 %v1043_v22, %v483_v52  ;;  %v426_v55 = vpop.f32.mrf.mxu0  ;;  %v446_v56 = vpop.f32.mrf.mxu1 }
  0xc3   : > { %v427_v57 = vadd.f32 %v1043_v22, %v426_v55  ;;  %v447_v58 = vadd.f32 %v1043_v22, %v446_v56 }
  0xc4   : > { %515 = vst [vmem:[%s1047_s21 + $0x98] sm:$0xff] %v464_v53 }
  0xc5   : > { %523 = vst [vmem:[%s1047_s21 + $0xd8] sm:$0xff] %v484_v54 }
  0xc6   : > { %500 = vst [vmem:[%s1047_s21 + $0x20] sm:$0xff] %v427_v57 }
  0xc7   : > { %508 = vst [vmem:[%s1047_s21 + $0x60] sm:$0xff] %v447_v58 }
  0xc9   : > { %v466_v59 = vpop.f32.mrf.mxu2  ;;  %v486_v60 = vpop.f32.mrf.mxu3 }
  0xca   : > { %v467_v61 = vadd.f32 %v1043_v22, %v466_v59  ;;  %v487_v62 = vadd.f32 %v1043_v22, %v486_v60  ;;  %v428_v63 = vpop.f32.mrf.mxu0  ;;  %v448_v0 = vpop.f32.mrf.mxu1 }
  0xcb   : > { %v429_v1 = vadd.f32 %v1043_v22, %v428_v63  ;;  %v449_v2 = vadd.f32 %v1043_v22, %v448_v0 }
  0xcc   : > { %516 = vst [vmem:[%s1047_s21 + $0xa0] sm:$0xff] %v467_v61 }
  0xcd   : > { %524 = vst [vmem:[%s1047_s21 + $0xe0] sm:$0xff] %v487_v62 }
  0xce   : > { %501 = vst [vmem:[%s1047_s21 + $0x28] sm:$0xff] %v429_v1 }
  0xcf   : > { %509 = vst [vmem:[%s1047_s21 + $0x68] sm:$0xff] %v449_v2 }
  0xd1   : > { %v468_v3 = vpop.f32.mrf.mxu2  ;;  %v488_v4 = vpop.f32.mrf.mxu3 }
  0xd2   : > { %v469_v5 = vadd.f32 %v1043_v22, %v468_v3  ;;  %v489_v6 = vadd.f32 %v1043_v22, %v488_v4  ;;  %v431_v7 = vpop.f32.mrf.mxu0  ;;  %v451_v8 = vpop.f32.mrf.mxu1 }
  0xd3   : > { %v432_v9 = vadd.f32 %v1043_v22, %v431_v7  ;;  %v452_v10 = vadd.f32 %v1043_v22, %v451_v8 }
  0xd4   : > { %517 = vst [vmem:[%s1047_s21 + $0xa8] sm:$0xff] %v469_v5 }
  0xd5   : > { %525 = vst [vmem:[%s1047_s21 + $0xe8] sm:$0xff] %v489_v6 }
  0xd6   : > { %502 = vst [vmem:[%s1047_s21 + $0x30] sm:$0xff] %v432_v9 }
  0xd7   : > { %510 = vst [vmem:[%s1047_s21 + $0x70] sm:$0xff] %v452_v10 }
  0xd9   : > { %v471_v11 = vpop.f32.mrf.mxu2  ;;  %v491_v12 = vpop.f32.mrf.mxu3 }
  0xda   : > { %v472_v13 = vadd.f32 %v1043_v22, %v471_v11  ;;  %v492_v14 = vadd.f32 %v1043_v22, %v491_v12  ;;  %v433_v15 = vpop.f32.mrf.mxu0  ;;  %v453_v16 = vpop.f32.mrf.mxu1 }
  0xdb   : > { %v434_v17 = vadd.f32 %v1043_v22, %v433_v15  ;;  %v454_v18 = vadd.f32 %v1043_v22, %v453_v16 }
  0xdc   : > { %518 = vst [vmem:[%s1047_s21 + $0xb0] sm:$0xff] %v472_v13 }
  0xdd   : > { %526 = vst [vmem:[%s1047_s21 + $0xf0] sm:$0xff] %v492_v14 }
  0xde   : > { %503 = vst [vmem:[%s1047_s21 + $0x38] sm:$0xff] %v434_v17 }
  0xdf   : > { %511 = vst [vmem:[%s1047_s21 + $0x78] sm:$0xff] %v454_v18 }
  0xe1   : > { %v473_v19 = vpop.f32.mrf.mxu2  ;;  %v493_v20 = vpop.f32.mrf.mxu3 }
  0xe2   : > { %v474_v21 = vadd.f32 %v1043_v22, %v473_v19  ;;  %v494_v23 = vadd.f32 %v1043_v22, %v493_v20 }
  0xe4   : > { %519 = vst [vmem:[%s1047_s21 + $0xb8] sm:$0xff] %v474_v21 }
  0xe5   : > { %527 = vst [vmem:[%s1047_s21 + $0xf8] sm:$0xff] %v494_v23 }
  0xe6   : > { %860 = shalt.err (!%p857_p5)
}
  0xe7   : > { %s913_s10 = smov 128   ;;  %s914_s18 = smov 8  }
  0xe8   : > { %775 = dma.vmem_to_hbm [thread:$0]  (%p975_p4), %s543_s15, 4096, %s545_s29, %s529_s30, %s913_s10, %s913_s10, %s914_s18  }
  0xe9 PF: > { %p781_p6 = scmp.ge.s32.totalorder %s911_s17, 2  ;;  %s559_s19 = sand.u32 1, %s891_s12  }
  0xea   : > { %s560_s21 = scalar_lea.sflag [#allocation3], %s559_s19 }
  0xeb   : > { %p778_p7 = pnand %p781_p6, %p982_p8 }
  0xed   : > { %p779_p9 = pneg %p778_p7 }
  0xef   : > { %886 = dma.done.wait (%p779_p9), %s560_s21, 4096  }
  0xf0   : > { %888 = vsyncadd (%p779_p9), %s560_s21, 4294963200  ;;  %s16_s17 = sadd.s32 1, %s911_s17   ;;  %s1156_s12 = smov %s895_s13 }
  0xf1   : > { %p13_p10 = scmp.ge.s32.totalorder %s16_s17, 4   ;;  %s1157_s13 = smov %s899_s14 }
  0xf2   : > { %s1158_s14 = smov %s988_s25  ;;  %s1159_s15 = smov %s907_s16 }
  0xf3   : > { %s1160_s16 = smov %s1162_s20  ;;  %15 = sbr.rel (!%p13_p10) target bundleno = 4 (0x4), region = 73 }
  0xf8   :  { %566 = vsyncpa [#allocation3], 1 }
  0xf9   :  { %568 = vsyncpa [#allocation3 + $0x1], 1 }

</bundles_post_ra>
